<compile_context>
chip_gen: v7x
topology: tpu7x:2x2x1
jax: 0.10.0
libtpu: 0.0.40
codegen_flags: <defaults>
</compile_context>

<pallas_src>
import jax
import jax.numpy as jnp
from jax.experimental import pallas as pl
from jax.experimental.pallas import tpu as pltpu


def _round_up(x: int, m: int) -> int:
    return ((x + m - 1) // m) * m


def _linear_kernel(x_ref, w_ref, o_ref):
    """One (tm, tn) output tile; accumulates over the k grid axis."""
    k = pl.program_id(2)

    # x_ref: (tm, tk), w_ref: (tn, tk)  ->  (tm, tn), contract on dim 1 of both
    part = jax.lax.dot_general(
        x_ref[...], w_ref[...],
        dimension_numbers=(((1,), (1,)), ((), ())),
        preferred_element_type=jnp.float32,
    )

    @pl.when(k == 0)
    def _():
        o_ref[...] = part

    @pl.when(k != 0)
    def _():
        o_ref[...] += part


def column_parallel_linear(x: jax.Array, weight: jax.Array,
                           bias: jax.Array | None = None,
                           *, tm: int = 256, tn: int = 256,
                           tk: int = 256) -> jax.Array:
    """Equivalent of ColumnParallelLinear.forward with world_size == 1."""
    *lead, k_in = x.shape
    n_out, k_w = weight.shape
    assert k_in == k_w, (k_in, k_w)

    x2 = x.reshape(-1, k_in)
    m = x2.shape[0]

    # Adaptive tiles: shrink to the (8, 128)-aligned full extent for small dims.
    tm_ = min(tm, _round_up(m, 8))
    tn_ = min(tn, _round_up(n_out, 128))   # output lane dim -> keep 128-dense
    tk_ = min(tk, _round_up(k_in, 128))

    m_pad = _round_up(m, tm_)
    n_pad = _round_up(n_out, tn_)
    k_pad = _round_up(k_in, tk_)

    # Pad only when needed (skipped entirely for 128-aligned production shapes).
    if (m_pad, k_pad) != (m, k_in):
        x2 = jnp.pad(x2, ((0, m_pad - m), (0, k_pad - k_in)))
    w = weight
    if (n_pad, k_pad) != (n_out, k_in):
        w = jnp.pad(w, ((0, n_pad - n_out), (0, k_pad - k_in)))

    grid = (m_pad // tm_, n_pad // tn_, k_pad // tk_)

    out = pl.pallas_call(
        _linear_kernel,
        out_shape=jax.ShapeDtypeStruct((m_pad, n_pad), jnp.float32),
        grid_spec=pltpu.PrefetchScalarGridSpec(
            num_scalar_prefetch=0,
            grid=grid,
            in_specs=[
                pl.BlockSpec((tm_, tk_), lambda i, j, k: (i, k)),  # x tile
                pl.BlockSpec((tn_, tk_), lambda i, j, k: (j, k)),  # weight tile
            ],
            out_specs=pl.BlockSpec((tm_, tn_), lambda i, j, k: (i, j)),
        ),
        compiler_params=pltpu.CompilerParams(
            dimension_semantics=("parallel", "parallel", "arbitrary")),
    )(x2, w)

    y = out[:m, :n_out]
    if bias is not None:
        y = y + bias
    return y.reshape(*lead, n_out)


if __name__ == "__main__":
    # Small deterministic shapes consistent with the module (bias=False default).
    in_features = 256
    out_features = 512
    batch, seq = 2, 8

    key = jax.random.PRNGKey(0)
    k_w, k_x = jax.random.split(key)

    # torch.empty is uninitialized; use a deterministic normal init instead.
    weight = 0.02 * jax.random.normal(k_w, (out_features, in_features),
                                      dtype=jnp.float32)
    x = jax.random.normal(k_x, (batch, seq, in_features), dtype=jnp.float32)

    y = column_parallel_linear(x, weight)
    y = jax.block_until_ready(y)

    # Reference: F.linear semantics, y = x @ W^T, in high precision.
    y_ref = jnp.einsum("bsk,nk->bsn", x, weight,
                       precision=jax.lax.Precision.HIGHEST)

    assert y.shape == (batch, seq, out_features)
    assert y.dtype == jnp.float32
    assert jnp.allclose(y, y_ref, atol=1e-3, rtol=1e-3), (
        float(jnp.max(jnp.abs(y - y_ref))))

    print("KERNEL_OK")
</pallas_src>

<mosaic_0001>
module attributes {stable_mosaic.version = 11 : i64} {
  func.func @_linear_kernel(%arg0: i32, %arg1: i32, %arg2: i32, %arg3: memref<16x256xf32, #tpu.memory_space<vmem>>, %arg4: memref<256x256xf32, #tpu.memory_space<vmem>>, %arg5: memref<16x256xf32, #tpu.memory_space<vmem>>) attributes {dimension_semantics = [#tpu.dimension_semantics<parallel>, #tpu.dimension_semantics<parallel>, #tpu.dimension_semantics<arbitrary>], iteration_bounds = array<i64: 1, 2, 1>, scalar_prefetch = 0 : i64, scratch_operands = 0 : i64, tpu.core_type = #tpu.core_type<tc>, window_params = [{transform_indices = @transform_0, window_bounds = array<i64: 16, 256>}, {transform_indices = @transform_1, window_bounds = array<i64: 256, 256>}, {transform_indices = @transform_2, window_bounds = array<i64: 16, 256>}]} {
    %c0 = arith.constant 0 : index
    %c0_0 = arith.constant 0 : index
    %0 = vector.load %arg3[%c0, %c0_0] : memref<16x256xf32, #tpu.memory_space<vmem>>, vector<16x256xf32>
    %c0_1 = arith.constant 0 : index
    %c0_2 = arith.constant 0 : index
    %1 = vector.load %arg4[%c0_1, %c0_2] : memref<256x256xf32, #tpu.memory_space<vmem>>, vector<256x256xf32>
    %cst = arith.constant dense<0.000000e+00> : vector<16x256xf32>
    %2 = tpu.matmul %0, %1, %cst {dimension_numbers = #tpu.dot_dimension_numbers<[1], [1], [0], [0], [0, 0, 1, 0], [], []>} : vector<16x256xf32>, vector<256x256xf32>, vector<16x256xf32> -> vector<16x256xf32>
    %c0_i32 = arith.constant 0 : i32
    %3 = arith.cmpi eq, %arg2, %c0_i32 : i32
    %4 = arith.extui %3 : i1 to i32
    %c0_i32_3 = arith.constant 0 : i32
    %5 = arith.cmpi ne, %4, %c0_i32_3 : i32
    scf.if %5 {
      %c0_6 = arith.constant 0 : index
      %c0_7 = arith.constant 0 : index
      %9 = vector.load %arg5[%c0_6, %c0_7] : memref<16x256xf32, #tpu.memory_space<vmem>>, vector<16x256xf32>
      tpu.vector_store %arg5[%c0_6, %c0_7], %2 {strides = array<i32>} : memref<16x256xf32, #tpu.memory_space<vmem>>, vector<16x256xf32>,
    } else {
    }
    %c0_i32_4 = arith.constant 0 : i32
    %6 = arith.cmpi ne, %arg2, %c0_i32_4 : i32
    %7 = arith.extui %6 : i1 to i32
    %c0_i32_5 = arith.constant 0 : i32
    %8 = arith.cmpi ne, %7, %c0_i32_5 : i32
    scf.if %8 {
      %c0_6 = arith.constant 0 : index
      %c0_7 = arith.constant 0 : index
      %9 = vector.load %arg5[%c0_6, %c0_7] : memref<16x256xf32, #tpu.memory_space<vmem>>, vector<16x256xf32>
      %10 = arith.addf %9, %2 : vector<16x256xf32>
      %c0_8 = arith.constant 0 : index
      %c0_9 = arith.constant 0 : index
      %11 = vector.load %arg5[%c0_8, %c0_9] : memref<16x256xf32, #tpu.memory_space<vmem>>, vector<16x256xf32>
      tpu.vector_store %arg5[%c0_8, %c0_9], %10 {strides = array<i32>} : memref<16x256xf32, #tpu.memory_space<vmem>>, vector<16x256xf32>,
    } else {
    }
    return
  }
  func.func @transform_0(%arg0: i32, %arg1: i32, %arg2: i32) -> (i32, i32) {
    %c0_i32 = arith.constant 0 : i32
    return %arg0, %arg2 : i32, i32
  }
  func.func @transform_1(%arg0: i32, %arg1: i32, %arg2: i32) -> (i32, i32) {
    %c0_i32 = arith.constant 0 : i32
    return %arg1, %arg2 : i32, i32
  }
  func.func @transform_2(%arg0: i32, %arg1: i32, %arg2: i32) -> (i32, i32) {
    %c0_i32 = arith.constant 0 : i32
    return %arg0, %arg1 : i32, i32
  }
}

</mosaic_0001>

<bundles_post_ra>
// kernel: tpu_custom_call.1
= control target key start
LH: loop header
LB: loop body
LE: loop exit
PB: predicated region body
PF: predicated region fallthrough
CT: control target
= control target key end

     0   :  { %7 = vsyncpa [#allocation3], 0  ;;  %s1171_s0 = inlined_call_operand.hbm [shape: f32[16,256], index: 0, kind: input, shape index: {}]   ;;  %s1172_s1 = inlined_call_operand.hbm [shape: f32[512,256], index: 1, kind: input, shape index: {}]   ;;  %s1173_s2 = inlined_call_operand.hbm [shape: f32[16,512], index: 2, kind: output, shape index: {}]  }
   0x1   :  { %8 = vsyncpa [#allocation6], 0 }
   0x2   :  { %10 = vsyncpa [#allocation6 + $0x1], 0 }
   0x3   :  { %11 = vsyncpa [#allocation4], 0 }
   0x4   :  { %13 = vsyncpa [#allocation4 + $0x1], 0  ;;  %s879_s9 = smov 0   ;;  %s881_s10 = smov 0  }
   0x5   :  { %s883_s11 = smov 0   ;;  %s885_s12 = smov 0  }
   0x6   :  { %s887_s13 = smov 0   ;;  %s889_s14 = smov 0  }
   0x7 LB: > { %s515_s15 = sadd.s32 4294967295, %s854_s14   ;;  %s516_s16 = sadd.s32 4294967294, %s854_s14   ;;  %s854_s14 = sphi %s889_s14, %s19_s14   ;;  %s850_s13 = sphi %s887_s13, %s1197_s13   ;;  %s846_s12 = sphi %s885_s12, %s1196_s12   ;;  %s842_s11 = sphi %s883_s11, %s1195_s11   ;;  %s838_s10 = sphi %s881_s10, %s1194_s10   ;;  %s834_s9 = sphi %s879_s9, %s1193_s9  }
   0x8   : > { %p88_p0 = scmp.ne.s32.totalorder %s838_s10, %s834_s9  ;;  %p913_p1 = scmp.eq.s32.totalorder %s515_s15, 0 }
   0x9   : > { %p917_p2 = scmp.eq.s32.totalorder %s515_s15, 1  ;;  %p120_p3 = scmp.eq.s32.totalorder %s516_s16, 1 }
   0xa   : > { %s1178_s17 = scalar_select %p913_p1, 1, 0 }
   0xb   : > { %s1179_s18 = scalar_select %p917_p2, 1, 0 }
   0xc   : > { %p923_p4 = por %p913_p1, %p88_p0  ;;  %p517_p5 = scmp.ge.s32.totalorder %s854_s14, 1 }
   0xd   : > { %p928_p6 = por %p120_p3, %p88_p0  ;;  %p127_p7 = scmp.lt.s32.totalorder %s854_s14, 3 }
   0xe   : > { %s1180_s19 = scalar_select %p923_p4, 1, 0 }
   0xf   : > { %s1181_s20 = scalar_select %p928_p6, 1, 0 }
  0x10   : > { %p933_p8 = pnand %p517_p5, %p127_p7  ;;  %s856_s22 = smov [#allocation2]  }
  0x11   : > { %s145_s23 = sshll.u32 %s856_s22, 4  ;;  %s34_s25 = sadd.s32 1, %s850_s13  ;;  %s146_s23 = int_to_ptr.vmem [resolvable:$true] %s145_s23 }
  0x12   : > { %s1182_s21 = scalar_select %p933_p8, 1, 0 }
  0x13   : > { %p640_p9 = pneg %p933_p8  ;;  %s710_s28 = scalar_lea.hbm %s1171_s0, 512 }
  0x14   : > { %p711_p12 = scmp.ne.s32.totalorder %s1171_s0, %s710_s28  ;;  %p717_p5 = scmp.lt.u32.totalorder %s710_s28, %s1171_s0 }
  0x15   : > { %p942_p11 = pnand %p640_p9, %p913_p1 }
  0x17   : > { %p712_p13 = pneg %p942_p11 }
  0x19   : > { %p713_p0 = pnand %p712_p13, %p711_p12 }
  0x1b   : > { %p714_p3 = pneg %p713_p0 }
  0x1d   : > { %p719_p7 = pnand %p717_p5, %p714_p3 }
  0x1f   : > { %722 = shalt.err (!%p719_p7)
}
  0x20   : > { %s723_s5 = scalar_lea.vmem %s146_s23, 512  ;;  %p731_p4 = scmp.lt.s32.totalorder %s146_s23, %s146_s23 }
  0x21   : > { %p724_p9 = scmp.ne.s32.totalorder %s146_s23, %s723_s5  ;;  %p732_p1 = scmp.lt.s32.totalorder %s723_s5, %s723_s5 }
  0x23   : > { %p726_p10 = pnand %p724_p9, %p712_p13  ;;  %p733_p8 = por %p732_p1, %p731_p4 }
  0x25   : > { %p727_p6 = pneg %p726_p10 }
  0x27   : > { %p734_p2 = pnand %p733_p8, %p727_p6 }
  0x29   : > { %737 = shalt.err (!%p734_p2)
}
  0x2a   : > { %s857_s6 = smov 256   ;;  %s858_s7 = smov 16  }
  0x2b   : > { %643 = dma.hbm_to_vmem [thread:$0]  (!%p942_p11), %s1171_s0, 512, %s146_s23, [#allocation3], %s857_s6, %s857_s6, %s858_s7  }
  0x2c   : > { %p36_p1 = scmp.ge.s32.totalorder %s34_s25, 2  ;;  %s75_s16 = sadd.s32 1, %s842_s11 }
  0x2d   : > { %p82_p2 = scmp.ne.s32.totalorder %s842_s11, %s838_s10  ;;  %p83_p4 = scmp.eq.s32.totalorder %s854_s14, 0 }
  0x2e   : > { %s1199_s25 = smov (%p36_p1, %s34_s25), 0  ;;  %p1185_p8 = scmp.ne.s32.totalorder %s1179_s18, 0 }
  0x2f   : > { %p972_p6 = por %p83_p4, %p82_p2  ;;  %s70_s26 = ssub.s32 %s850_s13, %s1199_s25 }
  0x30   : > { %p978_p10 = por %p1185_p8, %p82_p2  ;;  %p653_p12 = scmp.lt.s32.totalorder %s854_s14, 2 }
  0x31   : > { %p73_p11 = scmp.eq.s32.totalorder %s70_s26, 0  ;;  %s159_s23 = sand.u32 1, %s842_s11  }
  0x32   : > { %s520_s27 = sshll.u32 %s159_s23, 9  ;;  %s534_s29 = sshll.u32 %s850_s13, 13 }
  0x33   : > { %s987_s28 = scalar_select %p73_p11, %s842_s11, %s75_s16  }
  0x34   : > { %s993_s4 = scalar_lea.hbm %s1172_s1, %s534_s29  ;;  %s163_s18 = scalar_lea.vmem [#allocation5], %s520_s27 }
  0x35   : > { %s173_s5 = sshll.u32 %s163_s18, 4  ;;  %p999_p13 = pnand %p653_p12, %p972_p6  ;;  %s995_s5 = int_to_ptr.vmem [resolvable:$true] %s173_s5 }
  0x36   : > { %s1003_s15 = scalar_lea.sflag [#allocation6], %s159_s23  ;;  %s738_s16 = scalar_lea.hbm %s993_s4, 8192 }
  0x37   : > { %p739_p0 = scmp.ne.s32.totalorder %s993_s4, %s738_s16  ;;  %p740_p3 = pneg %p999_p13 }
  0x38   : > { %s743_s22 = scalar_lea.hbm %s1172_s1, 16384  ;;  %p744_p9 = scmp.lt.u32.totalorder %s993_s4, %s1172_s1 }
  0x39   : > { %p741_p5 = pnand %p740_p3, %p739_p0  ;;  %p745_p1 = scmp.lt.u32.totalorder %s743_s22, %s738_s16 }
  0x3a   : > { %p747_p4 = scmp.lt.u32.totalorder %s738_s16, %s993_s4 }
  0x3b   : > { %p742_p7 = pneg %p741_p5  ;;  %p746_p2 = por %p745_p1, %p744_p9 }
  0x3d   : > { %p748_p6 = por %p747_p4, %p746_p2 }
  0x3f   : > { %p749_p8 = pnand %p748_p6, %p742_p7 }
  0x41   : > { %752 = shalt.err (!%p749_p8)
}
  0x42   : > { %s753_s23 = scalar_lea.vmem %s995_s5, 8192  ;;  %s859_s3 = smov [#allocation5]  }
  0x43   : > { %p754_p12 = scmp.ne.s32.totalorder %s995_s5, %s753_s23  ;;  %s758_s18 = sshll.u32 %s859_s3, 4  ;;  %s759_s18 = int_to_ptr.vmem [resolvable:$false] %s758_s18 }
  0x44   : > { %s760_s26 = scalar_lea.vmem %s759_s18, 16384  ;;  %p761_p5 = scmp.lt.s32.totalorder %s995_s5, %s759_s18 }
  0x45   : > { %p756_p11 = pnand %p754_p12, %p740_p3  ;;  %p762_p9 = scmp.lt.s32.totalorder %s760_s26, %s753_s23 }
  0x47   : > { %p757_p0 = pneg %p756_p11  ;;  %p763_p1 = por %p762_p9, %p761_p5 }
  0x49   : > { %p764_p2 = pnand %p763_p1, %p757_p0 }
  0x4b   : > { %767 = shalt.err (!%p764_p2)
}
  0x4c   : > { %647 = dma.hbm_to_vmem [thread:$0]  (!%p999_p13), %s993_s4, 8192, %s995_s5, %s1003_s15, %s857_s6, %s857_s6, %s858_s7  }
  0x4d   : > { %p1188_p3 = scmp.ne.s32.totalorder %s1182_s21, 0 }
  0x4e   : > { %p1189_p7 = scmp.ne.s32.totalorder (!%p1188_p3), %s1178_s17, 0 }
  0x4f   : > { %185 = sbr.rel (%p1188_p3) target bundleno = 451 (0x1c3), region = 28 }
  0x56   : > { %821 = dma.done.wait (%p1189_p7), [#allocation3], 512  }
  0x57   : > { %823 = vsyncadd (%p1189_p7), [#allocation3], 4294966784  ;;  %s1041_s16 = sand.u32 1, %s838_s10   ;;  %p1190_p13 = scmp.ne.s32.totalorder %s1180_s19, 0 }
  0x58   : > { %s526_s8 = sshll.u32 %s1041_s16, 9  ;;  %s192_s27 = scalar_lea.sflag [#allocation6], %s1041_s16 }
  0x59   : > { %s1045_s22 = scalar_lea.vmem [#allocation5], %s526_s8 }
  0x5a   : > { %825 = dma.done.wait (%p1190_p13), %s192_s27, 8192  }
  0x5b   : > { %827 = vsyncadd (%p1190_p13), %s192_s27, 4294959104  ;;  %v227_v0 = vld [vmem:[%s1045_s22 + $0x8] sm:$0xff]  ;;  %v229_v1 = vld [vmem:[%s1045_s22 + $0x18] sm:$0xff]  ;;  %s527_s17 = sshll.u32 %s1041_s16, 5  ;;  %s535_s6 = sshll.u32 %s846_s12, 8 }
  0x5c   : > { %v226_v2 = vld [vmem:[%s1045_s22] sm:$0xff]  ;;  %v536_v3 = vpack.c.bf16 %v229_v1, %v227_v0  ;;  %v228_v4 = vld [vmem:[%s1045_s22 + $0x10] sm:$0xff]  ;;  %v231_v5 = vld [vmem:[%s1045_s22 + $0x28] sm:$0xff]  ;;  %s215_s19 = scalar_lea.vmem [#allocation7], %s527_s17  ;;  %s1122_s5 = scalar_lea.hbm %s1173_s2, %s535_s6 }
  0x5d   : > { %v233_v6 = vld [vmem:[%s1045_s22 + $0x38] sm:$0xff]  ;;  %v538_v7 = vpack.c.bf16 %v228_v4, %v226_v2  ;;  %v230_v9 = vld [vmem:[%s1045_s22 + $0x20] sm:$0xff]  ;;  %v232_v10 = vld [vmem:[%s1045_s22 + $0x30] sm:$0xff]  ;;  %s408_s21 = sshll.u32 %s215_s19, 4  ;;  %s392_s15 = scalar_lea.sflag [#allocation4], %s1041_s16  ;;  %s1117_s21 = int_to_ptr.vmem [resolvable:$true] %s408_s21 }
  0x5e   : > { %v540_v8 = vpack.c.bf16 %v233_v6, %v231_v5  ;;  %537 = vmatprep.subr.bf16.mxu0 %v536_v3  ;;  %600 = vmatprep.subr.bf16.mxu1 %v536_v3  ;;  %v235_v11 = vld [vmem:[%s1045_s22 + $0x48] sm:$0xff]  ;;  %v237_v12 = vld [vmem:[%s1045_s22 + $0x58] sm:$0xff]  ;;  %v542_v13 = vpack.c.bf16 %v232_v10, %v230_v9  ;;  %v234_v15 = vld [vmem:[%s1045_s22 + $0x40] sm:$0xff]  ;;  %s768_s12 = scalar_lea.vmem %s1117_s21, 512  ;;  %s860_s29 = smov [#allocation7]  }
  0x5f   : > { %539 = vmatpush1.bf16.xpose.msra.mxu0 %v538_v7  ;;  %616 = vmatpush1.bf16.xpose.msra.mxu1 %v538_v7  ;;  %v544_v14 = vpack.c.bf16 %v237_v12, %v235_v11  ;;  %v236_v16 = vld [vmem:[%s1045_s22 + $0x50] sm:$0xff]  ;;  %v239_v17 = vld [vmem:[%s1045_s22 + $0x68] sm:$0xff]  ;;  %v241_v18 = vld [vmem:[%s1045_s22 + $0x78] sm:$0xff]  ;;  %p769_p4 = scmp.ne.s32.totalorder %s1117_s21, %s768_s12  ;;  %s772_s30 = sshll.u32 %s860_s29, 4  ;;  %s773_s30 = int_to_ptr.vmem [resolvable:$false] %s772_s30 }
  0x60   : > { %541 = vmatprep.subr.bf16.mxu0 %v540_v8  ;;  %601 = vmatprep.subr.bf16.mxu1 %v540_v8  ;;  %v546_v19 = vpack.c.bf16 %v236_v16, %v234_v15  ;;  %v548_v20 = vpack.c.bf16 %v241_v18, %v239_v17  ;;  %v238_v21 = vld [vmem:[%s1045_s22 + $0x60] sm:$0xff]  ;;  %v240_v22 = vld [vmem:[%s1045_s22 + $0x70] sm:$0xff]  ;;  %v223_v23 = vld [vmem:[#allocation2 + $0x8] sm:$0xff]  ;;  %s774_s23 = scalar_lea.vmem %s773_s30, 1024  ;;  %p775_p12 = scmp.lt.s32.totalorder %s1117_s21, %s773_s30 }
  0x61   : > { %v225_v24 = vld [vmem:[#allocation2 + $0x18] sm:$0xff]  ;;  %v243_v25 = vld [vmem:[%s1045_s22 + $0x88] sm:$0xff]  ;;  %354 = vmatprep.mubr.f32.mxu0 %v223_v23  ;;  %v550_v27 = vpack.c.bf16 %v240_v22, %v238_v21  ;;  %v242_v29 = vld [vmem:[%s1045_s22 + $0x80] sm:$0xff]  ;;  %p770_p6 = pnand %p769_p4, %p978_p10  ;;  %p776_p11 = scmp.lt.s32.totalorder %s774_s23, %s768_s12 }
  0x62   : > { %v245_v26 = vld [vmem:[%s1045_s22 + $0x98] sm:$0xff]  ;;  %360 = vmatprep.mubr.f32.mxu1 %v225_v24  ;;  %v244_v30 = vld [vmem:[%s1045_s22 + $0x90] sm:$0xff]  ;;  %v247_v31 = vld [vmem:[%s1045_s22 + $0xa8] sm:$0xff] }
  0x63   : > { %v552_v28 = vpack.c.bf16 %v245_v26, %v243_v25  ;;  %v249_v32 = vld [vmem:[%s1045_s22 + $0xb8] sm:$0xff]  ;;  %v554_v33 = vpack.c.bf16 %v244_v30, %v242_v29  ;;  %v246_v35 = vld [vmem:[%s1045_s22 + $0xa0] sm:$0xff]  ;;  %v248_v36 = vld [vmem:[%s1045_s22 + $0xb0] sm:$0xff]  ;;  %p771_p8 = pneg %p770_p6  ;;  %p777_p0 = por %p776_p11, %p775_p12 }
  0x64   : > { %v556_v34 = vpack.c.bf16 %v249_v32, %v247_v31  ;;  %v251_v37 = vld [vmem:[%s1045_s22 + $0xc8] sm:$0xff]  ;;  %v253_v38 = vld [vmem:[%s1045_s22 + $0xd8] sm:$0xff]  ;;  %v558_v39 = vpack.c.bf16 %v248_v36, %v246_v35  ;;  %v250_v41 = vld [vmem:[%s1045_s22 + $0xc0] sm:$0xff] }
  0x65   : > { %v560_v40 = vpack.c.bf16 %v253_v38, %v251_v37  ;;  %v252_v42 = vld [vmem:[%s1045_s22 + $0xd0] sm:$0xff]  ;;  %v255_v43 = vld [vmem:[%s1045_s22 + $0xe8] sm:$0xff]  ;;  %v257_v44 = vld [vmem:[%s1045_s22 + $0xf8] sm:$0xff]  ;;  %p778_p5 = pnand %p777_p0, %p771_p8 }
  0x66   : > { %v562_v45 = vpack.c.bf16 %v252_v42, %v250_v41  ;;  %v564_v46 = vpack.c.bf16 %v257_v44, %v255_v43  ;;  %v254_v47 = vld [vmem:[%s1045_s22 + $0xe0] sm:$0xff]  ;;  %v256_v48 = vld [vmem:[%s1045_s22 + $0xf0] sm:$0xff]  ;;  %v259_v49 = vld [vmem:[%s1045_s22 + $0x108] sm:$0xff] }
  0x67   : > { %543 = vmatpush1.bf16.xpose.msra.mxu0 %v542_v13  ;;  %617 = vmatpush1.bf16.xpose.msra.mxu1 %v542_v13  ;;  %v261_v50 = vld [vmem:[%s1045_s22 + $0x118] sm:$0xff]  ;;  %v566_v51 = vpack.c.bf16 %v256_v48, %v254_v47  ;;  %v258_v53 = vld [vmem:[%s1045_s22 + $0x100] sm:$0xff]  ;;  %v260_v54 = vld [vmem:[%s1045_s22 + $0x110] sm:$0xff] }
  0x68   : > { %545 = vmatprep.subr.bf16.mxu0 %v544_v14  ;;  %602 = vmatprep.subr.bf16.mxu1 %v544_v14  ;;  %v568_v52 = vpack.c.bf16 %v261_v50, %v259_v49  ;;  %v263_v55 = vld [vmem:[%s1045_s22 + $0x128] sm:$0xff]  ;;  %v265_v56 = vld [vmem:[%s1045_s22 + $0x138] sm:$0xff]  ;;  %v570_v57 = vpack.c.bf16 %v260_v54, %v258_v53  ;;  %v262_v59 = vld [vmem:[%s1045_s22 + $0x120] sm:$0xff] }
  0x69   : > { %v572_v58 = vpack.c.bf16 %v265_v56, %v263_v55  ;;  %v264_v60 = vld [vmem:[%s1045_s22 + $0x130] sm:$0xff]  ;;  %v267_v61 = vld [vmem:[%s1045_s22 + $0x148] sm:$0xff]  ;;  %v269_v62 = vld [vmem:[%s1045_s22 + $0x158] sm:$0xff] }
  0x6a   : > { %v574_v63 = vpack.c.bf16 %v264_v60, %v262_v59  ;;  %v576_v0 = vpack.c.bf16 %v269_v62, %v267_v61  ;;  %v266_v1 = vld [vmem:[%s1045_s22 + $0x140] sm:$0xff]  ;;  %v268_v2 = vld [vmem:[%s1045_s22 + $0x150] sm:$0xff]  ;;  %v271_v3 = vld [vmem:[%s1045_s22 + $0x168] sm:$0xff] }
  0x6b   : > { %v273_v4 = vld [vmem:[%s1045_s22 + $0x178] sm:$0xff]  ;;  %v578_v5 = vpack.c.bf16 %v268_v2, %v266_v1  ;;  %v270_v7 = vld [vmem:[%s1045_s22 + $0x160] sm:$0xff]  ;;  %v272_v8 = vld [vmem:[%s1045_s22 + $0x170] sm:$0xff] }
  0x6c   : > { %v580_v6 = vpack.c.bf16 %v273_v4, %v271_v3  ;;  %v275_v9 = vld [vmem:[%s1045_s22 + $0x188] sm:$0xff]  ;;  %v277_v10 = vld [vmem:[%s1045_s22 + $0x198] sm:$0xff]  ;;  %v582_v11 = vpack.c.bf16 %v272_v8, %v270_v7  ;;  %v274_v13 = vld [vmem:[%s1045_s22 + $0x180] sm:$0xff] }
  0x6d   : > { %v584_v12 = vpack.c.bf16 %v277_v10, %v275_v9  ;;  %v276_v14 = vld [vmem:[%s1045_s22 + $0x190] sm:$0xff]  ;;  %v279_v15 = vld [vmem:[%s1045_s22 + $0x1a8] sm:$0xff]  ;;  %v281_v16 = vld [vmem:[%s1045_s22 + $0x1b8] sm:$0xff] }
  0x6e   : > { %v586_v17 = vpack.c.bf16 %v276_v14, %v274_v13  ;;  %v588_v18 = vpack.c.bf16 %v281_v16, %v279_v15  ;;  %v283_v21 = vld [vmem:[%s1045_s22 + $0x1c8] sm:$0xff]  ;;  %v285_v22 = vld [vmem:[%s1045_s22 + $0x1d8] sm:$0xff]  ;;  %v282_v25 = vld [vmem:[%s1045_s22 + $0x1c0] sm:$0xff] }
  0x6f   : > { %547 = vmatpush1.bf16.xpose.msra.mxu0 %v546_v19  ;;  %618 = vmatpush1.bf16.xpose.msra.mxu1 %v546_v19  ;;  %v278_v19 = vld [vmem:[%s1045_s22 + $0x1a0] sm:$0xff]  ;;  %v592_v24 = vpack.c.bf16 %v285_v22, %v283_v21  ;;  %v284_v26 = vld [vmem:[%s1045_s22 + $0x1d0] sm:$0xff] }
  0x70   : > { %549 = vmatprep.subr.bf16.mxu0 %v548_v20  ;;  %603 = vmatprep.subr.bf16.mxu1 %v548_v20  ;;  %v280_v20 = vld [vmem:[%s1045_s22 + $0x1b0] sm:$0xff]  ;;  %v594_v29 = vpack.c.bf16 %v284_v26, %v282_v25  ;;  %v286_v31 = vld [vmem:[%s1045_s22 + $0x1e0] sm:$0xff] }
  0x71   : > { %v590_v23 = vpack.c.bf16 %v280_v20, %v278_v19  ;;  %v288_v32 = vld [vmem:[%s1045_s22 + $0x1f0] sm:$0xff] }
  0x72   : > { %v224_v35 = vld [vmem:[#allocation2 + $0x10] sm:$0xff] }
  0x77   : > { %551 = vmatpush1.bf16.xpose.msra.mxu0 %v550_v27  ;;  %619 = vmatpush1.bf16.xpose.msra.mxu1 %v550_v27  ;;  %v287_v27 = vld [vmem:[%s1045_s22 + $0x1e8] sm:$0xff] }
  0x78   : > { %553 = vmatprep.subr.bf16.mxu0 %v552_v28  ;;  %604 = vmatprep.subr.bf16.mxu1 %v552_v28  ;;  %v289_v28 = vld [vmem:[%s1045_s22 + $0x1f8] sm:$0xff] }
  0x79   : > { %v596_v30 = vpack.c.bf16 %v289_v28, %v287_v27 }
  0x7f   : > { %555 = vmatpush1.bf16.xpose.msra.mxu0 %v554_v33  ;;  %620 = vmatpush1.bf16.xpose.msra.mxu1 %v554_v33  ;;  %v598_v33 = vpack.c.bf16 %v288_v32, %v286_v31 }
  0x80   : > { %557 = vmatprep.subr.bf16.mxu0 %v556_v34  ;;  %605 = vmatprep.subr.bf16.mxu1 %v556_v34  ;;  %v222_v34 = vld [vmem:[#allocation2] sm:$0xff] }
  0x87   : > { %559 = vmatpush1.bf16.xpose.msra.mxu0 %v558_v39  ;;  %621 = vmatpush1.bf16.xpose.msra.mxu1 %v558_v39 }
  0x88   : > { %561 = vmatprep.subr.bf16.mxu0 %v560_v40  ;;  %606 = vmatprep.subr.bf16.mxu1 %v560_v40 }
  0x8f   : > { %563 = vmatpush1.bf16.xpose.msra.mxu0 %v562_v45  ;;  %622 = vmatpush1.bf16.xpose.msra.mxu1 %v562_v45 }
  0x90   : > { %565 = vmatprep.subr.bf16.mxu0 %v564_v46  ;;  %607 = vmatprep.subr.bf16.mxu1 %v564_v46 }
  0x97   : > { %567 = vmatpush1.bf16.xpose.msra.mxu0 %v566_v51  ;;  %623 = vmatpush1.bf16.xpose.msra.mxu1 %v566_v51 }
  0x98   : > { %569 = vmatprep.subr.bf16.mxu0 %v568_v52  ;;  %608 = vmatprep.subr.bf16.mxu1 %v568_v52 }
  0x9f   : > { %571 = vmatpush1.bf16.xpose.msra.mxu0 %v570_v57  ;;  %624 = vmatpush1.bf16.xpose.msra.mxu1 %v570_v57 }
  0xa0   : > { %573 = vmatprep.subr.bf16.mxu0 %v572_v58  ;;  %609 = vmatprep.subr.bf16.mxu1 %v572_v58 }
  0xa7   : > { %575 = vmatpush1.bf16.xpose.msra.mxu0 %v574_v63  ;;  %625 = vmatpush1.bf16.xpose.msra.mxu1 %v574_v63 }
  0xa8   : > { %577 = vmatprep.subr.bf16.mxu0 %v576_v0  ;;  %610 = vmatprep.subr.bf16.mxu1 %v576_v0 }
  0xaf   : > { %579 = vmatpush1.bf16.xpose.msra.mxu0 %v578_v5  ;;  %626 = vmatpush1.bf16.xpose.msra.mxu1 %v578_v5 }
  0xb0   : > { %581 = vmatprep.subr.bf16.mxu0 %v580_v6  ;;  %611 = vmatprep.subr.bf16.mxu1 %v580_v6 }
  0xb7   : > { %583 = vmatpush1.bf16.xpose.msra.mxu0 %v582_v11  ;;  %627 = vmatpush1.bf16.xpose.msra.mxu1 %v582_v11 }
  0xb8   : > { %585 = vmatprep.subr.bf16.mxu0 %v584_v12  ;;  %612 = vmatprep.subr.bf16.mxu1 %v584_v12 }
  0xbf   : > { %587 = vmatpush1.bf16.xpose.msra.mxu0 %v586_v17  ;;  %628 = vmatpush1.bf16.xpose.msra.mxu1 %v586_v17 }
  0xc0   : > { %589 = vmatprep.subr.bf16.mxu0 %v588_v18  ;;  %613 = vmatprep.subr.bf16.mxu1 %v588_v18 }
  0xc7   : > { %591 = vmatpush1.bf16.xpose.msra.mxu0 %v590_v23  ;;  %629 = vmatpush1.bf16.xpose.msra.mxu1 %v590_v23 }
  0xc8   : > { %593 = vmatprep.subr.bf16.mxu0 %v592_v24  ;;  %614 = vmatprep.subr.bf16.mxu1 %v592_v24 }
  0xcf   : > { %595 = vmatpush1.bf16.xpose.msra.mxu0 %v594_v29  ;;  %630 = vmatpush1.bf16.xpose.msra.mxu1 %v594_v29 }
  0xd0   : > { %597 = vmatprep.subr.bf16.mxu0 %v596_v30  ;;  %615 = vmatprep.subr.bf16.mxu1 %v596_v30 }
  0xd7   : > { %599 = vmatpush1.bf16.xpose.msra.mxu0 %v598_v33  ;;  %631 = vmatpush1.bf16.xpose.msra.mxu1 %v598_v33 }
  0xde   : > { %355 = vmatmul.mubr.f32.vlgmr.msra.gmra.mrb[0].mxu0 %v222_v34  ;;  %361 = vmatmul.mubr.f32.vlgmr.msra.gmra.mrb[0].mxu1 %v224_v35 }
 0x1b1   : > { %v356_v36 = vpop.f32.mrb[0].mxu0  ;;  %v362_v37 = vpop.f32.mrb[0].mxu1 }
 0x1b2   : > { %371 = vst [vmem:[%s215_s19] sm:$0xff] %v356_v36  ;;  %373 = vst [vmem:[%s215_s19 + $0x10] sm:$0xff] %v362_v37  ;;  %v358_v38 = vpop.f32.mrb[1].mxu0  ;;  %v364_v39 = vpop.f32.mrb[1].mxu1 }
 0x1b3   : > { %372 = vst [vmem:[%s215_s19 + $0x8] sm:$0xff] %v358_v38  ;;  %374 = vst [vmem:[%s215_s19 + $0x18] sm:$0xff] %v364_v39 }
 0x1b4   : > { %781 = shalt.err (!%p778_p5)
}
 0x1b5   : > { %s782_s3 = scalar_lea.hbm %s1122_s5, 512  ;;  %s786_s8 = scalar_lea.hbm %s1173_s2, 1024 }
 0x1b6   : > { %p783_p9 = scmp.ne.s32.totalorder %s1122_s5, %s782_s3  ;;  %p787_p3 = scmp.lt.u32.totalorder %s1122_s5, %s1173_s2 }
 0x1b7   : > { %p788_p7 = scmp.lt.u32.totalorder %s786_s8, %s782_s3  ;;  %p790_p4 = scmp.lt.u32.totalorder %s782_s3, %s1122_s5 }
 0x1b8   : > { %p784_p1 = pnand %p783_p9, %p978_p10 }
 0x1b9   : > { %p789_p13 = por %p788_p7, %p787_p3 }
 0x1ba   : > { %p785_p2 = pneg %p784_p1 }
 0x1bb   : > { %p791_p6 = por %p790_p4, %p789_p13 }
 0x1bd   : > { %p792_p8 = pnand %p791_p6, %p785_p2 }
 0x1bf   : > { %795 = shalt.err (!%p792_p8)
}
 0x1c0   : > { %s861_s17 = smov 256   ;;  %s862_s19 = smov 512  }
 0x1c1   : > { %s863_s6 = smov 16  }
 0x1c2   : > { %638 = dma.vmem_to_hbm [thread:$0]  (%p978_p10), %s1117_s21, 512, %s1122_s5, %s392_s15, %s861_s17, %s862_s19, %s863_s6  }
 0x1c3 PF: > { %s423_s7 = sand.u32 1, %s834_s9   ;;  %p1191_p12 = scmp.ne.s32.totalorder %s1181_s20, 0 }
 0x1c4   : > { %p1192_p11 = scmp.ge.s32.totalorder %s854_s14, 2  ;;  %s424_s4 = scalar_lea.sflag [#allocation4], %s423_s7 }
 0x1c6   : > { %p649_p0 = pnand %p1192_p11, %p1191_p12 }
 0x1c8   : > { %829 = dma.done.wait (!%p649_p0), %s424_s4, 512  }
 0x1c9   : > { %831 = vsyncadd (!%p649_p0), %s424_s4, 4294966784  ;;  %s19_s14 = sadd.s32 1, %s854_s14   ;;  %s1193_s9 = smov %s838_s10 }
 0x1ca   : > { %p16_p5 = scmp.ge.s32.totalorder %s19_s14, 4   ;;  %s1194_s10 = smov %s842_s11 }
 0x1cb   : > { %s1195_s11 = smov %s987_s28  ;;  %s1196_s12 = smov %s850_s13 }
 0x1cc   : > { %s1197_s13 = smov %s1199_s25  ;;  %18 = sbr.rel (!%p16_p5) target bundleno = 7 (0x7), region = 87 }
 0x1d3   :  { %429 = vsyncpa [#allocation3], 1 }
 0x1d4   :  { %431 = vsyncpa [#allocation3 + $0x1], 1 }
 0x1d5   :  { %432 = vsyncpa [#allocation6], 1 }
 0x1d6   :  { %434 = vsyncpa [#allocation6 + $0x1], 1 }
 0x1d7   :  { %435 = vsyncpa [#allocation4], 1 }
 0x1d8   :  { %437 = vsyncpa [#allocation4 + $0x1], 1 }

</bundles_post_ra>
